<compile_context>
chip_gen: v6e
topology: v6e:2x2x1
jax: 0.10.0
libtpu: 0.0.40
codegen_flags: <defaults>
</compile_context>

<pallas_src>
import functools

import numpy as np
import jax
import jax.numpy as jnp
from jax.experimental import pallas as pl
from jax.experimental.pallas import tpu as pltpu


def _bilinear_matrix(out_size, in_size, pad=0):
    """Interpolation matrix matching nn.Upsample(scale_factor=2, mode='bilinear',
    align_corners=False). Optional zero rows of width `pad` on both ends (folds the
    conv's SAME zero padding into the upsample)."""
    m = np.zeros((out_size + 2 * pad, in_size), dtype=np.float32)
    scale = in_size / out_size
    for i in range(out_size):
        src = (i + 0.5) * scale - 0.5
        f = int(np.floor(src))
        frac = src - f
        i0 = min(max(f, 0), in_size - 1)
        i1 = min(max(f + 1, 0), in_size - 1)
        m[i + pad, i0] += 1.0 - frac
        m[i + pad, i1] += frac
    return jnp.asarray(m)


def _up_conv_kernel(x1h_ref, uh_ref, g_ref, b_ref, out_ref, *, h, w, cout):
    """One batch element: upsample+conv folded into 4 MXU matmuls.

    x1h_ref: (1, H, Cin*W)        input image, channels packed into lanes
    uh_ref : (3*2H, H)            stacked H-upsample matrices (one per ky tap)
    g_ref  : (3, Cin*W, Cout*2W)  folded [W-upsample x 3x3-taps x channel-mix] matrices
    b_ref  : (1, Cout*2W)         bias, repeated per output x position
    out_ref: (1, 2H, Cout*2W)     conv result, output channels packed into lanes
    """
    H2, W2 = 2 * h, 2 * w
    # Batched H-direction upsample for all input channels at once (single MXU matmul);
    # rows [ky*H2:(ky+1)*H2] are the upsample shifted by conv tap ky (zero-padded edges).
    a = jnp.dot(uh_ref[...], x1h_ref[0], preferred_element_type=jnp.float32)

    acc = jnp.broadcast_to(b_ref[...], (H2, cout * W2)).astype(jnp.float32)
    for ky in range(3):  # 3 MXU matmuls; dx taps / W-upsample / channel mix live in G[ky]
        acc = acc + jnp.dot(a[ky * H2:(ky + 1) * H2, :], g_ref[ky],
                            preferred_element_type=jnp.float32)
    out_ref[0] = acc.astype(out_ref.dtype)


def bilinear_up_and_concat(x1, x2, weight, bias):
    N, Cin, H, W = x1.shape
    Cout = weight.shape[0]
    N2, C2, H2c, W2c = x2.shape
    H2, W2 = 2 * H, 2 * W
    assert N2 == N and H2c == H2 and W2c == W2

    dt = jnp.float32
    x1 = x1.astype(dt)
    weight = weight.astype(dt)
    bias = bias.astype(dt)

    # ---- constants folded wrapper-side (once) -------------------------------------
    up_h_pad = _bilinear_matrix(H2, H, pad=1)   # (2H+2, H), zero top/bottom row
    up_w_pad = _bilinear_matrix(W2, W, pad=1)   # (2W+2, W), zero left/right row
    # UH_stack[ky*H2 + y, h] = up_h_pad[y + ky, h]
    uh_stack = jnp.concatenate([up_h_pad[ky:ky + H2] for ky in range(3)], axis=0)  # (3*H2, H)
    # up_w_shift[kx, x, w] = up_w_pad[x + kx, w]
    up_w_shift = jnp.stack([up_w_pad[kx:kx + W2] for kx in range(3)], axis=0)      # (3, W2, W)
    # G[ky][c*W + w, o*W2 + x] = sum_kx weight[o, c, ky, kx] * up_w_pad[x + kx, w]
    g = jnp.einsum('ocyk,kxw->ycwox', weight, up_w_shift).reshape(3, Cin * W, Cout * W2)
    b_row = jnp.repeat(bias, W2)[None, :]                                          # (1, Cout*W2)

    # x1 packed as (N, H, Cin*W): channels in the lane axis for a single batched matmul.
    x1h = jnp.transpose(x1, (0, 2, 1, 3)).reshape(N, H, Cin * W)

    kernel = functools.partial(_up_conv_kernel, h=H, w=W, cout=Cout)

    conv_packed = pl.pallas_call(
        kernel,
        out_shape=jax.ShapeDtypeStruct((N, H2, Cout * W2), dt),
        grid=(N,),
        in_specs=[
            pl.BlockSpec((1, H, Cin * W), lambda n: (n, 0, 0)),
            pl.BlockSpec((3 * H2, H), lambda n: (0, 0)),
            pl.BlockSpec((3, Cin * W, Cout * W2), lambda n: (0, 0, 0)),
            pl.BlockSpec((1, Cout * W2), lambda n: (0, 0)),
        ],
        out_specs=pl.BlockSpec((1, H2, Cout * W2), lambda n: (n, 0, 0)),
        compiler_params=pltpu.CompilerParams(
            dimension_semantics=("parallel",),   # batch elements are independent (2 TCs on v7x)
            vmem_limit_bytes=32 * 1024 * 1024,
        ),
    )(x1h, uh_stack, g, b_row)

    # Unpack lanes -> NCHW (layout plumbing) and do the concat wrapper-side so x2 never
    # travels through the kernel's VMEM/vreg pipeline.
    conv = conv_packed.reshape(N, H2, Cout, W2).transpose(0, 2, 1, 3)
    return jnp.concatenate([conv, x2.astype(dt)], axis=1)


# ------------------------- pure-JAX reference (independent path) -----------------------
def _upsample_bilinear_x2_ref(x):
    """Direct gather implementation of torch bilinear x2 upsample, align_corners=False."""
    N, C, H, W = x.shape

    def idx(out_size, in_size):
        src = (jnp.arange(out_size) + 0.5) * (in_size / out_size) - 0.5
        f = jnp.floor(src)
        frac = src - f
        i0 = jnp.clip(f, 0, in_size - 1).astype(jnp.int32)
        i1 = jnp.clip(f + 1, 0, in_size - 1).astype(jnp.int32)
        return i0, i1, frac

    h0, h1, fh = idx(2 * H, H)
    w0, w1, fw = idx(2 * W, W)
    t = x[:, :, h0, :] * (1.0 - fh)[None, None, :, None] + x[:, :, h1, :] * fh[None, None, :, None]
    return t[:, :, :, w0] * (1.0 - fw) + t[:, :, :, w1] * fw


def reference(x1, x2, weight, bias):
    up = _upsample_bilinear_x2_ref(x1)
    conv = jax.lax.conv_general_dilated(
        up, weight, window_strides=(1, 1), padding=((1, 1), (1, 1)),
        dimension_numbers=('NCHW', 'OIHW', 'NCHW')) + bias[None, :, None, None]
    return jnp.concatenate([conv, x2], axis=1)


if __name__ == "__main__":
    key = jax.random.PRNGKey(0)
    k1, k2, kw, kb = jax.random.split(key, 4)

    N, Cin, Cout, H, W = 2, 4, 4, 16, 16
    C2 = Cout  # UNet-style skip connection

    x1 = jax.random.normal(k1, (N, Cin, H, W), dtype=jnp.float32)
    x2 = jax.random.normal(k2, (N, C2, 2 * H, 2 * W), dtype=jnp.float32)
    weight = 0.1 * jax.random.normal(kw, (Cout, Cin, 3, 3), dtype=jnp.float32)
    bias = 0.1 * jax.random.normal(kb, (Cout,), dtype=jnp.float32)

    out = jax.block_until_ready(bilinear_up_and_concat(x1, x2, weight, bias))
    ref = reference(x1, x2, weight, bias)

    assert out.shape == (N, Cout + C2, 2 * H, 2 * W)
    np.testing.assert_allclose(np.asarray(out), np.asarray(ref), rtol=1e-3, atol=1e-3)
    print("KERNEL_OK")
</pallas_src>

<mosaic_0001>
module attributes {stable_mosaic.version = 11 : i64} {
  func.func @_up_conv_kernel(%arg0: i32, %arg1: memref<1x16x64xf32, #tpu.memory_space<vmem>>, %arg2: memref<96x16xf32, #tpu.memory_space<vmem>>, %arg3: memref<3x64x128xf32, #tpu.memory_space<vmem>>, %arg4: memref<1x128xf32, #tpu.memory_space<vmem>>, %arg5: memref<1x32x128xf32, #tpu.memory_space<vmem>>) attributes {dimension_semantics = [#tpu.dimension_semantics<parallel>], iteration_bounds = array<i64: 2>, scalar_prefetch = 0 : i64, scratch_operands = 0 : i64, tpu.core_type = #tpu.core_type<tc>, window_params = [{transform_indices = @transform_0, window_bounds = array<i64: 1, 16, 64>}, {pipeline_mode = #tpu.pipeline_mode<synchronous>, transform_indices = @transform_1, window_bounds = array<i64: 96, 16>}, {pipeline_mode = #tpu.pipeline_mode<synchronous>, transform_indices = @transform_2, window_bounds = array<i64: 3, 64, 128>}, {pipeline_mode = #tpu.pipeline_mode<synchronous>, transform_indices = @transform_3, window_bounds = array<i64: 1, 128>}, {transform_indices = @transform_4, window_bounds = array<i64: 1, 32, 128>}]} {
    %c0 = arith.constant 0 : index
    %c0_0 = arith.constant 0 : index
    %0 = vector.load %arg2[%c0, %c0_0] : memref<96x16xf32, #tpu.memory_space<vmem>>, vector<96x16xf32>
    %c0_1 = arith.constant 0 : index
    %c0_2 = arith.constant 0 : index
    %c0_3 = arith.constant 0 : index
    %1 = vector.load %arg1[%c0_1, %c0_2, %c0_3] : memref<1x16x64xf32, #tpu.memory_space<vmem>>, vector<1x16x64xf32>
    %2 = vector.shape_cast %1 : vector<1x16x64xf32> to vector<16x64xf32>
    %cst = arith.constant dense<0.000000e+00> : vector<96x64xf32>
    %3 = tpu.matmul %0, %2, %cst {dimension_numbers = #tpu.dot_dimension_numbers<[1], [0], [0], [1], [0, 0, 1, 1], [], []>} : vector<96x16xf32>, vector<16x64xf32>, vector<96x64xf32> -> vector<96x64xf32>
    %c0_4 = arith.constant 0 : index
    %c0_5 = arith.constant 0 : index
    %4 = vector.load %arg4[%c0_4, %c0_5] : memref<1x128xf32, #tpu.memory_space<vmem>>, vector<1x128xf32>
    %5 = vector.shape_cast %4 : vector<1x128xf32> to vector<1x128xf32>
    %6 = vector.broadcast %5 : vector<1x128xf32> to vector<32x128xf32>
    %7 = vector.extract_strided_slice %3 {offsets = [0, 0], sizes = [32, 64], strides = [1, 1]} : vector<96x64xf32> to vector<32x64xf32>
    %c0_6 = arith.constant 0 : index
    %c0_7 = arith.constant 0 : index
    %c0_8 = arith.constant 0 : index
    %8 = vector.load %arg3[%c0_6, %c0_7, %c0_8] : memref<3x64x128xf32, #tpu.memory_space<vmem>>, vector<1x64x128xf32>
    %9 = vector.shape_cast %8 : vector<1x64x128xf32> to vector<64x128xf32>
    %cst_9 = arith.constant dense<0.000000e+00> : vector<32x128xf32>
    %10 = tpu.matmul %7, %9, %cst_9 {dimension_numbers = #tpu.dot_dimension_numbers<[1], [0], [0], [1], [0, 0, 1, 1], [], []>} : vector<32x64xf32>, vector<64x128xf32>, vector<32x128xf32> -> vector<32x128xf32>
    %11 = arith.addf %6, %10 : vector<32x128xf32>
    %12 = vector.extract_strided_slice %3 {offsets = [32, 0], sizes = [32, 64], strides = [1, 1]} : vector<96x64xf32> to vector<32x64xf32>
    %c1 = arith.constant 1 : index
    %c0_10 = arith.constant 0 : index
    %c0_11 = arith.constant 0 : index
    %13 = vector.load %arg3[%c1, %c0_10, %c0_11] : memref<3x64x128xf32, #tpu.memory_space<vmem>>, vector<1x64x128xf32>
    %14 = vector.shape_cast %13 : vector<1x64x128xf32> to vector<64x128xf32>
    %cst_12 = arith.constant dense<0.000000e+00> : vector<32x128xf32>
    %15 = tpu.matmul %12, %14, %cst_12 {dimension_numbers = #tpu.dot_dimension_numbers<[1], [0], [0], [1], [0, 0, 1, 1], [], []>} : vector<32x64xf32>, vector<64x128xf32>, vector<32x128xf32> -> vector<32x128xf32>
    %16 = arith.addf %11, %15 : vector<32x128xf32>
    %17 = vector.extract_strided_slice %3 {offsets = [64, 0], sizes = [32, 64], strides = [1, 1]} : vector<96x64xf32> to vector<32x64xf32>
    %c2 = arith.constant 2 : index
    %c0_13 = arith.constant 0 : index
    %c0_14 = arith.constant 0 : index
    %18 = vector.load %arg3[%c2, %c0_13, %c0_14] : memref<3x64x128xf32, #tpu.memory_space<vmem>>, vector<1x64x128xf32>
    %19 = vector.shape_cast %18 : vector<1x64x128xf32> to vector<64x128xf32>
    %cst_15 = arith.constant dense<0.000000e+00> : vector<32x128xf32>
    %20 = tpu.matmul %17, %19, %cst_15 {dimension_numbers = #tpu.dot_dimension_numbers<[1], [0], [0], [1], [0, 0, 1, 1], [], []>} : vector<32x64xf32>, vector<64x128xf32>, vector<32x128xf32> -> vector<32x128xf32>
    %21 = arith.addf %16, %20 : vector<32x128xf32>
    %c0_16 = arith.constant 0 : index
    %c0_17 = arith.constant 0 : index
    %c0_18 = arith.constant 0 : index
    %22 = vector.load %arg5[%c0_16, %c0_17, %c0_18] : memref<1x32x128xf32, #tpu.memory_space<vmem>>, vector<1x32x128xf32>
    %23 = vector.shape_cast %22 : vector<1x32x128xf32> to vector<32x128xf32>
    %24 = vector.shape_cast %21 : vector<32x128xf32> to vector<1x32x128xf32>
    tpu.vector_store %arg5[%c0_16, %c0_17, %c0_18], %24 {strides = array<i32>} : memref<1x32x128xf32, #tpu.memory_space<vmem>>, vector<1x32x128xf32>,
    return
  }
  func.func @transform_0(%arg0: i32) -> (i32, i32, i32) {
    %c0_i32 = arith.constant 0 : i32
    %c0_i32_0 = arith.constant 0 : i32
    %c0_i32_1 = arith.constant 0 : i32
    return %arg0, %c0_i32, %c0_i32_0 : i32, i32, i32
  }
  func.func @transform_1(%arg0: i32) -> (i32, i32) {
    %c0_i32 = arith.constant 0 : i32
    %c0_i32_0 = arith.constant 0 : i32
    %c0_i32_1 = arith.constant 0 : i32
    return %c0_i32, %c0_i32_0 : i32, i32
  }
  func.func @transform_2(%arg0: i32) -> (i32, i32, i32) {
    %c0_i32 = arith.constant 0 : i32
    %c0_i32_0 = arith.constant 0 : i32
    %c0_i32_1 = arith.constant 0 : i32
    %c0_i32_2 = arith.constant 0 : i32
    return %c0_i32, %c0_i32_0, %c0_i32_1 : i32, i32, i32
  }
  func.func @transform_3(%arg0: i32) -> (i32, i32) {
    %c0_i32 = arith.constant 0 : i32
    %c0_i32_0 = arith.constant 0 : i32
    %c0_i32_1 = arith.constant 0 : i32
    return %c0_i32, %c0_i32_0 : i32, i32
  }
  func.func @transform_4(%arg0: i32) -> (i32, i32, i32) {
    %c0_i32 = arith.constant 0 : i32
    %c0_i32_0 = arith.constant 0 : i32
    %c0_i32_1 = arith.constant 0 : i32
    return %arg0, %c0_i32, %c0_i32_0 : i32, i32, i32
  }
}

</mosaic_0001>

<bundles_post_ra>
// kernel: tpu_custom_call.1
= control target key start
LH: loop header
LB: loop body
LE: loop exit
PB: predicated region body
PF: predicated region fallthrough
CT: control target
= control target key end

     0   :  { %9 = vsyncpa [#allocation3], 0  ;;  %s1359_s0 = inlined_call_operand.vmem [shape: f32[2,16,64], index: 0, kind: input, shape index: {}]   ;;  %s1360_s1 = inlined_call_operand.vmem [shape: f32[96,16], index: 1, kind: input, shape index: {}]   ;;  %s1361_s2 = inlined_call_operand.hbm [shape: f32[3,64,128], index: 2, kind: input, shape index: {}]   ;;  %s1362_s3 = inlined_call_operand.vmem [shape: f32[1,128], index: 3, kind: input, shape index: {}]   ;;  %s1363_s4 = inlined_call_operand.hbm [shape: f32[2,32,128], index: 4, kind: output, shape index: {}]  }
   0x1   :  { %10 = vsyncpa [#allocation4], 0 }
   0x2   :  { %12 = vsyncpa [#allocation4 + $0x1], 0  ;;  %s1172_s15 = smov 0   ;;  %s1174_s16 = smov 0  }
   0x3   :  { %s1176_s17 = smov 0   ;;  %s1178_s18 = smov 0  }
   0x4 LB: > { %s1193_s19 = sadd.s32 4294967295, %s1139_s18   ;;  %s816_s20 = sadd.s32 4294967294, %s1139_s18   ;;  %s1139_s18 = sphi %s1178_s18, %s1371_s18   ;;  %s1135_s17 = sphi %s1176_s17, %s1370_s17   ;;  %s1131_s16 = sphi %s1174_s16, %s1369_s16   ;;  %s1127_s15 = sphi %s1172_s15, %s1368_s15  }
   0x5   : > { %s1197_s21 = sadd.s32 1, %s1139_s18   ;;  %s114_s22 = sadd.s32 1, %s1135_s17 }
   0x6   : > { %s111_s23 = ssub.s32 %s1139_s18, %s1197_s21  ;;  %p124_p0 = scmp.ne.s32.totalorder %s1135_s17, %s1131_s16 }
   0x7   : > { %p112_p1 = scmp.eq.s32.totalorder %s111_s23, 0  ;;  %p125_p2 = scmp.eq.s32.totalorder %s1193_s19, 1 }
   0x8   : > { %p130_p3 = scmp.ne.s32.totalorder %s1131_s16, %s1127_s15  ;;  %p131_p4 = scmp.eq.s32.totalorder %s816_s20, 1 }
   0x9   : > { %s1208_s24 = scalar_select %p112_p1, %s1135_s17, %s114_s22  }
   0xa   : > { %p1210_p5 = por %p125_p2, %p124_p0  ;;  %p1214_p6 = por %p131_p4, %p130_p3 }
   0xb   : > { %p817_p7 = scmp.ge.s32.totalorder %s1139_s18, 1  ;;  %p138_p8 = scmp.lt.s32.totalorder %s1139_s18, 3 }
   0xc   : > { %s1365_s26 = scalar_select %p1214_p6, 1, 0 }
   0xd   : > { %p1009_p9 = scmp.eq.s32.totalorder %s1193_s19, 0  ;;  %p1221_p10 = pnand %p817_p7, %p138_p8 }
   0xe   : > { %s1141_s28 = smov [#allocation2]  }
   0xf   : > { %s153_s29 = sshll.u32 %s1141_s28, 4  ;;  %p1001_p11 = pneg %p1221_p10  ;;  %s154_s29 = int_to_ptr.vmem [resolvable:$true] %s153_s29 }
  0x10   : > { %s1060_s30 = scalar_lea.vmem %s154_s29, 3072  ;;  %p1068_p3 = scmp.lt.s32.totalorder %s154_s29, %s154_s29 }
  0x11   : > { %p1002_p12 = pnand %p1009_p9, %p1001_p11  ;;  %p1061_p0 = scmp.ne.s32.totalorder %s154_s29, %s1060_s30 }
  0x12   : > { %p1069_p4 = scmp.lt.s32.totalorder %s1060_s30, %s1060_s30 }
  0x13   : > { %p1051_p13 = pneg %p1002_p12 }
  0x14   : > { %p1070_p6 = por %p1069_p4, %p1068_p3 }
  0x15   : > { %p1063_p1 = pnand %p1061_p0, %p1051_p13 }
  0x17   : > { %p1064_p2 = pneg %p1063_p1 }
  0x19   : > { %p1071_p7 = pnand %p1070_p6, %p1064_p2 }
  0x1b   : > { %1074 = shalt.err (!%p1071_p7)
}
  0x1c   : > { %s1142_s5 = smov 128   ;;  %s1143_s6 = smov 8  }
  0x1d   : > { %1004 = dma.hbm_to_vmem [thread:$0]  (!%p1002_p12), %s1361_s2, 3072, %s154_s29, [#allocation3], %s1142_s5, %s1142_s5, %s1143_s6  }
  0x1e   : > { %180 = sbr.rel (%p1221_p10) target bundleno = 474 (0x1da), region = 36 }
  0x23   : > { %1118 = dma.done.wait (%p1009_p9), [#allocation3], 3072  }
  0x24   : > { %1120 = vsyncadd (%p1009_p9), [#allocation3], 4294964224  ;;  %p206_p8 = scmp.lt.s32.totalorder %s1193_s19, 1  ;;  %vm225_vm0 = vcmask 130048   ;;  %v211_v2 = vld [vmem:[%s1360_s1] sm:$0xff]  ;;  %v212_v3 = vld [vmem:[%s1360_s1 + $0x8] sm:$0xff] }
  0x25   : > { %911 = vmatprep.mubr.msk.f32.mxu0 %vm225_vm0, %v211_v2  ;;  %v213_v4 = vld [vmem:[%s1360_s1 + $0x10] sm:$0xff]  ;;  %v401_v5 = vld [vmem:[#allocation2 + $0x38] sm:$0xff]  ;;  %v399_v9 = vld [vmem:[#allocation2 + $0x28] sm:$0xff]  ;;  %vm402_vm1 = vcmask 523264   ;;  %s203_s6 = sand.u32 1, %s1131_s16   ;;  %s1144_s20 = smov [#allocation5]  }
  0x26   : > { %s207_s9 = scalar_select %p206_p8, %s1193_s19, 1  ;;  %929 = vmatprep.subr.mxu1 %v401_v5  ;;  %v400_v6 = vld [vmem:[#allocation2 + $0x30] sm:$0xff]  ;;  %v512_v7 = vld [vmem:[#allocation2 + $0x78] sm:$0xff]  ;;  %v215_v10 = vld [vmem:[%s1360_s1 + $0x20] sm:$0xff] }
  0x27   : > { %v214_v8 = vld [vmem:[%s1360_s1 + $0x18] sm:$0xff]  ;;  %930 = vmatpush3.msra.mxu1 %v401_v5  ;;  %v398_v11 = vld [vmem:[#allocation2 + $0x20] sm:$0xff]  ;;  %v511_v12 = vld [vmem:[#allocation2 + $0x70] sm:$0xff]  ;;  %s822_s7 = sshll.u32 %s203_s6, 5  ;;  %s1079_s22 = sshll.u32 %s1144_s20, 4  ;;  %s1080_s22 = int_to_ptr.vmem [resolvable:$false] %s1079_s22 }
  0x28   : > { %s855_s10 = sshll.u32 %s207_s9, 4  ;;  %931 = vmatprep.subr.mxu1 %v400_v6  ;;  %v216_v13 = vld [vmem:[%s1360_s1 + $0x28] sm:$0xff]  ;;  %v397_v14 = vld [vmem:[#allocation2 + $0x18] sm:$0xff]  ;;  %v217_v15 = vld [vmem:[%s1360_s1 + $0x30] sm:$0xff]  ;;  %s205_s8 = scalar_lea.vmem [#allocation5], %s822_s7 }
  0x29   : > { %s210_s13 = scalar_lea.vmem %s1359_s0, %s855_s10  ;;  %932 = vmatpush3.msra.mxu1 %v400_v6  ;;  %v396_v16 = vld [vmem:[#allocation2 + $0x10] sm:$0xff]  ;;  %v510_v17 = vld [vmem:[#allocation2 + $0x68] sm:$0xff]  ;;  %v218_v18 = vld [vmem:[%s1360_s1 + $0x38] sm:$0xff]  ;;  %s742_s9 = sshll.u32 %s205_s8, 4  ;;  %s1310_s9 = int_to_ptr.vmem [resolvable:$true] %s742_s9 }
  0x2a   : > { %v224_v0 = vld [vmem:[%s210_s13 + $0x8] sm:$0xff]  ;;  %v223_v1 = vld [vmem:[%s210_s13] sm:$0xff]  ;;  %933 = vmatprep.subr.mxu1 %v399_v9  ;;  %v221_v21 = vld [vmem:[%s1360_s1 + $0x50] sm:$0xff]  ;;  %s856_s10 = sshll.u32 %s1193_s19, 9  ;;  %s1319_s19 = scalar_lea.sflag [#allocation4], %s203_s6 }
  0x2b   : > { %907 = vmatprep.subr.mxu0 %v224_v0  ;;  %934 = vmatpush3.msra.mxu1 %v399_v9  ;;  %v219_v19 = vld [vmem:[%s1360_s1 + $0x40] sm:$0xff]  ;;  %v220_v20 = vld [vmem:[%s1360_s1 + $0x48] sm:$0xff]  ;;  %v222_v22 = vld [vmem:[%s1360_s1 + $0x58] sm:$0xff]  ;;  %s1315_s13 = scalar_lea.hbm %s1363_s4, %s856_s10  ;;  %s1075_s14 = scalar_lea.vmem %s1310_s9, 512 }
  0x2c   : > { %908 = vmatpush3.msra.mxu0 %v224_v0  ;;  %935 = vmatprep.subr.mxu1 %v398_v11  ;;  %v395_v23 = vld [vmem:[#allocation2 + $0x8] sm:$0xff]  ;;  %v394_v24 = vld [vmem:[#allocation2] sm:$0xff]  ;;  %v508_v26 = vld [vmem:[#allocation2 + $0x58] sm:$0xff]  ;;  %p1076_p6 = scmp.ne.s32.totalorder %s1310_s9, %s1075_s14  ;;  %s1081_s23 = scalar_lea.vmem %s1080_s22, 1024 }
  0x2d   : > { %909 = vmatprep.subr.mxu0 %v223_v1  ;;  %936 = vmatpush3.msra.mxu1 %v398_v11  ;;  %v509_v25 = vld [vmem:[#allocation2 + $0x60] sm:$0xff]  ;;  %v622_v27 = vld [vmem:[#allocation2 + $0xb8] sm:$0xff]  ;;  %v507_v28 = vld [vmem:[#allocation2 + $0x50] sm:$0xff]  ;;  %p1082_p11 = scmp.lt.s32.totalorder %s1310_s9, %s1080_s22  ;;  %p1083_p12 = scmp.lt.s32.totalorder %s1081_s23, %s1075_s14 }
  0x2e   : > { %910 = vmatpush3.msra.mxu0 %v223_v1  ;;  %937 = vmatprep.subr.mxu1 %v397_v14  ;;  %v506_v29 = vld [vmem:[#allocation2 + $0x48] sm:$0xff]  ;;  %v505_v30 = vld [vmem:[#allocation2 + $0x40] sm:$0xff]  ;;  %v621_v33 = vld [vmem:[#allocation2 + $0xb0] sm:$0xff]  ;;  %p1077_p9 = pnand %p1076_p6, %p1210_p5 }
  0x2f   : > { %912 = vmatmul.mubr.msk.f32.vlgmr.msra.gmra.mxu0 %vm225_vm0, %v212_v3  ;;  %951 = vmatprep.subr.mxu0 %v512_v7  ;;  %v620_v35 = vld [vmem:[#allocation2 + $0xa8] sm:$0xff]  ;;  %v619_v37 = vld [vmem:[#allocation2 + $0xa0] sm:$0xff]  ;;  %v618_v39 = vld [vmem:[#allocation2 + $0x98] sm:$0xff]  ;;  %p1084_p13 = por %p1083_p12, %p1082_p11 }
  0x30   : > { %914 = vmatprep.mubr.msk.f32.mxu0 %vm225_vm0, %v213_v4  ;;  %952 = vmatpush3.msra.mxu0 %v512_v7  ;;  %v617_v41 = vld [vmem:[#allocation2 + $0x90] sm:$0xff]  ;;  %v616_v43 = vld [vmem:[#allocation2 + $0x88] sm:$0xff]  ;;  %v615_v45 = vld [vmem:[#allocation2 + $0x80] sm:$0xff]  ;;  %p1078_p10 = pneg %p1077_p9 }
  0x31   : > { %953 = vmatprep.subr.mxu0 %v511_v12  ;;  %938 = vmatpush3.msra.mxu1 %v397_v14  ;;  %v837_v53 = vld [vmem:[%s1362_s3] ss:$0 sm:$0xff] }
  0x32   : > { %954 = vmatpush3.msra.mxu0 %v511_v12  ;;  %939 = vmatprep.subr.mxu1 %v396_v16  ;;  %p1085_p0 = pnand %p1084_p13, %p1078_p10 }
  0x33   : > { %915 = vmatmul.mubr.msk.f32.gmra.mxu0 %vm225_vm0, %v214_v8  ;;  %955 = vmatprep.subr.mxu0 %v510_v17 }
  0x34   : > { %917 = vmatprep.mubr.msk.f32.mxu0 %vm225_vm0, %v215_v10  ;;  %940 = vmatpush3.msra.mxu1 %v396_v16 }
  0x35   : > { %956 = vmatpush3.msra.mxu0 %v510_v17  ;;  %941 = vmatprep.subr.mxu1 %v395_v23 }
  0x36   : > { %942 = vmatpush3.msra.mxu1 %v395_v23  ;;  %957 = vmatprep.subr.mxu0 %v509_v25 }
  0x37   : > { %918 = vmatmul.mubr.msk.f32.gmra.mxu0 %vm225_vm0, %v216_v13  ;;  %943 = vmatprep.subr.mxu1 %v394_v24 }
  0x38   : > { %920 = vmatprep.mubr.msk.f32.mxu0 %vm225_vm0, %v217_v15  ;;  %944 = vmatpush3.msra.mxu1 %v394_v24 }
  0x39   : > { %958 = vmatpush3.msra.mxu0 %v509_v25  ;;  %973 = vmatprep.subr.mxu1 %v622_v27 }
  0x3a   : > { %959 = vmatprep.subr.mxu0 %v508_v26 }
  0x3b   : > { %921 = vmatmul.mubr.msk.f32.gmra.mxu0 %vm225_vm0, %v218_v18 }
  0x3c   : > { %923 = vmatprep.mubr.msk.f32.mxu0 %vm225_vm0, %v219_v19  ;;  %960 = vmatpush3.msra.mxu0 %v508_v26 }
  0x3d   : > { %961 = vmatprep.subr.mxu0 %v507_v28 }
  0x3e   : > { %962 = vmatpush3.msra.mxu0 %v507_v28 }
  0x3f   : > { %924 = vmatmul.mubr.msk.f32.gmra.mxu0 %vm225_vm0, %v220_v20  ;;  %963 = vmatprep.subr.mxu0 %v506_v29 }
  0x40   : > { %926 = vmatprep.mubr.msk.f32.mxu0 %vm225_vm0, %v221_v21  ;;  %964 = vmatpush3.msra.mxu0 %v506_v29 }
  0x41   : > { %965 = vmatprep.subr.mxu0 %v505_v30 }
  0x42   : > { %966 = vmatpush3.msra.mxu0 %v505_v30 }
  0x43   : > { %927 = vmatmul.mubr.msk.f32.gmra.mxu0 %vm225_vm0, %v222_v22 }
  0xef   : > { %v913_v31 = vpop.f32.mrf.mxu0 }
  0xf1   : > { %v328_v32 = vpop.f32.mrf.mxu0 }
  0xf2   : > { %945 = vmatprep.mubr.msk.f32.mxu1 %vm402_vm1, %v328_v32 }
  0xf3   : > { %v916_v34 = vpop.f32.mrf.mxu0  ;;  %946 = vmatmul.mubr.msk.f32.vlgmr.msra.gmra.mxu1 %vm402_vm1, %v913_v31 }
  0xf4   : > { %974 = vmatpush3.msra.mxu1 %v622_v27 }
  0xf5   : > { %v338_v36 = vpop.f32.mrf.mxu0  ;;  %975 = vmatprep.subr.mxu1 %v621_v33 }
  0xf6   : > { %948 = vmatprep.mubr.msk.f32.mxu1 %vm402_vm1, %v338_v36  ;;  %976 = vmatpush3.msra.mxu1 %v621_v33 }
  0xf7   : > { %v919_v38 = vpop.f32.mrf.mxu0  ;;  %949 = vmatmul.mubr.msk.f32.gmra.mxu1 %vm402_vm1, %v916_v34  ;;  %977 = vmatprep.subr.mxu1 %v620_v35 }
  0xf8   : > { %978 = vmatpush3.msra.mxu1 %v620_v35 }
  0xf9   : > { %v348_v40 = vpop.f32.mrf.mxu0  ;;  %979 = vmatprep.subr.mxu1 %v619_v37 }
  0xfa   : > { %967 = vmatprep.mubr.msk.f32.mxu0 %vm402_vm1, %v348_v40  ;;  %980 = vmatpush3.msra.mxu1 %v619_v37 }
  0xfb   : > { %v922_v42 = vpop.f32.mrf.mxu0  ;;  %968 = vmatmul.mubr.msk.f32.vlgmr.msra.gmra.mxu0 %vm402_vm1, %v919_v38  ;;  %981 = vmatprep.subr.mxu1 %v618_v39 }
  0xfc   : > { %982 = vmatpush3.msra.mxu1 %v618_v39 }
  0xfd   : > { %v358_v44 = vpop.f32.mrf.mxu0  ;;  %983 = vmatprep.subr.mxu1 %v617_v41 }
  0xfe   : > { %970 = vmatprep.mubr.msk.f32.mxu0 %vm402_vm1, %v358_v44  ;;  %984 = vmatpush3.msra.mxu1 %v617_v41 }
  0xff   : > { %v925_v46 = vpop.f32.mrf.mxu0  ;;  %971 = vmatmul.mubr.msk.f32.gmra.mxu0 %vm402_vm1, %v922_v42  ;;  %985 = vmatprep.subr.mxu1 %v616_v43 }
 0x100   : > { %986 = vmatpush3.msra.mxu1 %v616_v43 }
 0x101   : > { %v368_v47 = vpop.f32.mrf.mxu0  ;;  %987 = vmatprep.subr.mxu1 %v615_v45 }
 0x102   : > { %988 = vmatpush3.msra.mxu1 %v615_v45  ;;  %989 = vmatprep.mubr.msk.f32.mxu1 %vm402_vm1, %v368_v47 }
 0x103   : > { %v928_v48 = vpop.f32.mrf.mxu0  ;;  %990 = vmatmul.mubr.msk.f32.vlgmr.msra.gmra.mxu1 %vm402_vm1, %v925_v46 }
 0x105   : > { %v378_v49 = vpop.f32.mrf.mxu0 }
 0x106   : > { %992 = vmatprep.mubr.msk.f32.mxu1 %vm402_vm1, %v378_v49 }
 0x107   : > { %993 = vmatmul.mubr.msk.f32.gmra.mxu1 %vm402_vm1, %v928_v48 }
 0x1b3   : > { %v947_v50 = vpop.f32.mrf.mxu1 }
 0x1b4   : > { %v501_v56 = vadd.f32 %v947_v50, %v837_v53 }
 0x1b5   : > { %v481_v51 = vpop.f32.mrf.mxu1 }
 0x1b6   : > { %v500_v59 = vadd.f32 %v837_v53, %v481_v51 }
 0x1b7   : > { %v950_v54 = vpop.f32.mrf.mxu1 }
 0x1b8   : > { %v503_v62 = vadd.f32 %v950_v54, %v837_v53 }
 0x1b9   : > { %v491_v57 = vpop.f32.mrf.mxu1 }
 0x1ba   : > { %v502_v3 = vadd.f32 %v837_v53, %v491_v57 }
 0x1bb   : > { %v969_v52 = vpop.f32.mrf.mxu0 }
 0x1bc   : > { %v611_v60 = vadd.f32 %v969_v52, %v501_v56 }
 0x1bd   : > { %v591_v55 = vpop.f32.mrf.mxu0 }
 0x1be   : > { %v610_v63 = vadd.f32 %v591_v55, %v500_v59 }
 0x1bf   : > { %v972_v58 = vpop.f32.mrf.mxu0 }
 0x1c0   : > { %v613_v4 = vadd.f32 %v972_v58, %v503_v62 }
 0x1c1   : > { %v601_v1 = vpop.f32.mrf.mxu0 }
 0x1c2   : > { %v612_v7 = vadd.f32 %v601_v1, %v502_v3 }
 0x1c3   : > { %v991_v61 = vpop.f32.mrf.mxu1 }
 0x1c4   : > { %v721_v0 = vadd.f32 %v991_v61, %v611_v60 }
 0x1c5   : > { %v701_v2 = vpop.f32.mrf.mxu1 }
 0x1c6   : > { %725 = vst [vmem:[%s205_s8 + $0x8] sm:$0xff] %v721_v0  ;;  %v720_v5 = vadd.f32 %v701_v2, %v610_v63 }
 0x1c7   : > { %v994_v6 = vpop.f32.mrf.mxu1 }
 0x1c8   : > { %724 = vst [vmem:[%s205_s8] sm:$0xff] %v720_v5  ;;  %v723_v8 = vadd.f32 %v994_v6, %v613_v4 }
 0x1c9   : > { %v711_v9 = vpop.f32.mrf.mxu1 }
 0x1ca   : > { %727 = vst [vmem:[%s205_s8 + $0x18] sm:$0xff] %v723_v8  ;;  %v722_v10 = vadd.f32 %v711_v9, %v612_v7 }
 0x1cc   : > { %726 = vst [vmem:[%s205_s8 + $0x10] sm:$0xff] %v722_v10 }
 0x1cd   : > { %1088 = shalt.err (!%p1085_p0)
}
 0x1ce   : > { %s1089_s27 = scalar_lea.hbm %s1315_s13, 512  ;;  %s1093_s30 = scalar_lea.hbm %s1363_s4, 1024 }
 0x1cf   : > { %p1090_p1 = scmp.ne.s32.totalorder %s1315_s13, %s1089_s27  ;;  %p1094_p4 = scmp.lt.s32.totalorder %s1315_s13, %s1363_s4 }
 0x1d0   : > { %p1095_p7 = scmp.lt.s32.totalorder %s1093_s30, %s1089_s27 }
 0x1d1   : > { %p1091_p2 = pnand %p1090_p1, %p1210_p5 }
 0x1d2   : > { %p1096_p8 = por %p1095_p7, %p1094_p4 }
 0x1d3   : > { %p1092_p3 = pneg %p1091_p2 }
 0x1d5   : > { %p1097_p6 = pnand %p1096_p8, %p1092_p3 }
 0x1d7   : > { %1100 = shalt.err (!%p1097_p6)
}
 0x1d8   : > { %s1145_s7 = smov 128   ;;  %s1146_s8 = smov 8  }
 0x1d9   : > { %999 = dma.vmem_to_hbm [thread:$0]  (%p1210_p5), %s1310_s9, 512, %s1315_s13, %s1319_s19, %s1145_s7, %s1145_s7, %s1146_s8  }
 0x1da PF: > { %p1011_p9 = scmp.ge.s32.totalorder %s1139_s18, 2  ;;  %s757_s10 = sand.u32 1, %s1127_s15  }
 0x1db   : > { %p1367_p10 = scmp.ne.s32.totalorder %s1365_s26, 0  ;;  %s758_s11 = scalar_lea.sflag [#allocation4], %s757_s10 }
 0x1dd   : > { %p1006_p11 = pnand %p1011_p9, %p1367_p10 }
 0x1df   : > { %p1007_p12 = pneg %p1006_p11 }
 0x1e1   : > { %1122 = dma.done.wait (%p1007_p12), %s758_s11, 512  }
 0x1e2   : > { %1124 = vsyncadd (%p1007_p12), %s758_s11, 4294966784  ;;  %p15_p13 = scmp.ge.s32.totalorder %s1197_s21, 4   ;;  %s1368_s15 = smov %s1131_s16 }
 0x1e3   : > { %s1369_s16 = smov %s1135_s17  ;;  %s1370_s17 = smov %s1208_s24 }
 0x1e4   : > { %s1371_s18 = smov %s1197_s21  ;;  %17 = sbr.rel (!%p15_p13) target bundleno = 4 (0x4), region = 78 }
 0x1e9   :  { %763 = vsyncpa [#allocation3], 1 }
 0x1ea   :  { %765 = vsyncpa [#allocation3 + $0x1], 1 }
 0x1eb   :  { %766 = vsyncpa [#allocation4], 1 }
 0x1ec   :  { %768 = vsyncpa [#allocation4 + $0x1], 1 }

</bundles_post_ra>
